<compile_context>
chip_gen: v7x
topology: tpu7x:2x2x1
jax: 0.10.0
libtpu: 0.0.40
codegen_flags: <defaults>
</compile_context>

<pallas_src>
import functools

import jax
import jax.numpy as jnp
from jax.experimental import pallas as pl
from jax.experimental.pallas import tpu as pltpu


# --------------------------------------------------------------------------- helpers

def _vmem_capacity_bytes() -> int:
    """Physical VMEM per core; conservative (v7x-sized) default if the query fails."""
    try:
        cap = int(pltpu.get_tpu_info().vmem_capacity_bytes)
        if cap > 0:
            return cap
    except Exception:
        pass
    return 64 * 1024 * 1024


def _divisor_tile(n: int, unit: int, cap: int):
    """Largest multiple of `unit` that divides `n` and is <= cap (None if none)."""
    best = None
    t = unit
    cap = min(n, cap)
    while t <= cap:
        if n % t == 0:
            best = t
        t += unit
    return best


# --------------------------------------------------------------------------- kernels

def _partial_sums_kernel(x_ref, shift_ref, sum_ref, sq_ref, sum_acc, sq_acc,
                         *, k: int, fold_w: int):
    """Per-row partial sum / sum-of-squares of (x - shift) over the lane (HW) axis.

    x_ref:     (rows, lane_tile) input tile
    shift_ref: (rows, 1) f32 per-row shift (running mean of the row's channel)
    sum_ref:   (rows, 1) f32 output, written on the last lane tile
    sq_ref:    (rows, 1) f32 output, written on the last lane tile
    sum_acc/sq_acc: (rows, fold_w) f32 scratch (folded accumulators, k = lane_tile/fold_w)
    """
    t = pl.program_id(1)

    @pl.when(t == 0)
    def _():
        sum_acc[...] = jnp.zeros_like(sum_acc)
        sq_acc[...] = jnp.zeros_like(sq_acc)

    sh = shift_ref[...]                                        # (rows, 1) f32
    x0 = x_ref[:, 0:fold_w].astype(jnp.float32) - sh
    s = x0
    q = x0 * x0
    for i in range(1, k):                                      # static unroll
        xi = x_ref[:, i * fold_w:(i + 1) * fold_w].astype(jnp.float32) - sh
        s = s + xi
        q = q + xi * xi
    sum_acc[...] += s                                          # one acc ld/st per k x-slices
    sq_acc[...] += q

    @pl.when(t == pl.num_programs(1) - 1)
    def _():
        # Cross-lane (XLU) reduce once per row tile.
        sum_ref[...] = jnp.sum(sum_acc[...], axis=1, keepdims=True)
        sq_ref[...] = jnp.sum(sq_acc[...], axis=1, keepdims=True)


def _normalize_kernel(x_ref, mean_ref, inv_std_ref, y_ref):
    # y = (x - mean) * inv_std  -- one sub and one broadcast mul per element.
    x = x_ref[...].astype(jnp.float32)
    y_ref[...] = ((x - mean_ref[...]) * inv_std_ref[...]).astype(y_ref.dtype)


def _fused_kernel(x_ref, mean_ref, var_ref, count_ref,
                  y_ref, new_mean_ref, new_var_ref, new_count_ref,
                  *, n_batch: float, m_total: float):
    """Small-input fast path: x fully resident, reduce + Welford merge + normalize."""
    x = x_ref[...].astype(jnp.float32)                         # (N, C, HW)
    sh = mean_ref[...]                                         # (C, 1) running mean as shift
    xs = x - sh[None, :, :]
    s1 = jnp.sum(jnp.sum(xs, axis=2, keepdims=True), axis=0)   # (C, 1)
    s2 = jnp.sum(jnp.sum(xs * xs, axis=2, keepdims=True), axis=0)
    d = s1 / m_total
    batch_mean = sh + d
    batch_var = jnp.maximum(s2 / m_total - d * d, 0.0)

    old_mean = mean_ref[...]
    old_var = var_ref[...]
    old_count = count_ref[0, 0]
    new_count = old_count + n_batch
    m_a = old_var * old_count
    m_b = batch_var * n_batch
    delta = batch_mean - old_mean
    m2 = m_a + m_b + delta * delta * (old_count * n_batch / new_count)
    upd_var = m2 / new_count
    upd_mean = (old_count * old_mean + n_batch * batch_mean) / new_count
    inv_std = jax.lax.rsqrt(jnp.maximum(upd_var, 0.01))

    new_mean_ref[...] = upd_mean
    new_var_ref[...] = upd_var
    new_count_ref[0, 0] = new_count
    y_ref[...] = ((x - upd_mean[None, :, :]) * inv_std[None, :, :]).astype(y_ref.dtype)


# --------------------------------------------------------------------------- wrapper

def running_mean_and_var_forward(
    x, mean, var, count, *,
    training: bool = True,
    fused_bytes_limit=None,
    max_lane_tile: int = 16384,
    max_rows_per_block=None,
):
    """Forward pass of RunningMeanAndVar.

    Args:
      x:     (N, C, H, W) — NCHW, same as the PyTorch module (f32 or bf16).
      mean:  (1, C, 1, 1) float32 buffer.
      var:   (1, C, 1, 1) float32 buffer.
      count: ()           float32 buffer.
    Returns:
      y (N, C, H, W) in x.dtype, new_mean (1, C, 1, 1), new_var (1, C, 1, 1), new_count ().
    """
    N, C, H, W = x.shape
    HW = H * W
    NC = N * C
    x_item = x.dtype.itemsize

    mean_c = mean.reshape(C, 1).astype(jnp.float32)
    var_c = var.reshape(C, 1).astype(jnp.float32)
    count_s = jnp.reshape(count, (1, 1)).astype(jnp.float32)

    # Per-generation VMEM budgets (v5e/v6e 128 MiB, v7x 64 MiB physical).
    vmem_cap = _vmem_capacity_bytes()
    vmem_limit = int(min(vmem_cap * 3 // 4, 96 * 1024 * 1024))
    work_budget = int(min(vmem_cap * 45 // 100, 56 * 1024 * 1024))
    if fused_bytes_limit is None:
        fused_bytes_limit = min(vmem_cap // 16, 4 * 1024 * 1024)

    # ---------------- fused fast path: single launch, x resident in VMEM -----------
    if training and NC * HW * 4 <= fused_bytes_limit:
        x3 = x.reshape(N, C, HW)                               # free reshape
        y3, new_mean_c, new_var_c, new_count = pl.pallas_call(
            functools.partial(_fused_kernel, n_batch=float(N), m_total=float(N * HW)),
            grid=(1,),
            in_specs=[
                pl.BlockSpec((N, C, HW), lambda i: (0, 0, 0)),
                pl.BlockSpec((C, 1), lambda i: (0, 0)),
                pl.BlockSpec((C, 1), lambda i: (0, 0)),
                pl.BlockSpec(memory_space=pltpu.MemorySpace.SMEM),
            ],
            out_specs=(
                pl.BlockSpec((N, C, HW), lambda i: (0, 0, 0)),
                pl.BlockSpec((C, 1), lambda i: (0, 0)),
                pl.BlockSpec((C, 1), lambda i: (0, 0)),
                pl.BlockSpec(memory_space=pltpu.MemorySpace.SMEM),
            ),
            out_shape=(
                jax.ShapeDtypeStruct((N, C, HW), x.dtype),
                jax.ShapeDtypeStruct((C, 1), jnp.float32),
                jax.ShapeDtypeStruct((C, 1), jnp.float32),
                jax.ShapeDtypeStruct((1, 1), jnp.float32),
            ),
            compiler_params=pltpu.CompilerParams(
                dimension_semantics=("arbitrary",),
                vmem_limit_bytes=vmem_limit),
        )(x3, mean_c, var_c, count_s)
        return (y3.reshape(N, C, H, W),
                new_mean_c.reshape(1, C, 1, 1),
                new_var_c.reshape(1, C, 1, 1),
                new_count.reshape(()))

    # ---------------- two-phase tiled path ------------------------------------------
    # Flat, lane-dense 2-D view: row = (n, c), lanes = spatial. Free reshape.
    x2 = x.reshape(NC, HW)

    # Lane tile: largest multiple of 128 dividing HW (lane-dense, unmasked stores);
    # full HW as fallback when HW is not a 128 multiple.
    # TODO(synk): zero-pad HW to a 128 multiple instead of the full-width fallback.
    lane_tile = _divisor_tile(HW, 128, min(HW, max_lane_tile)) or HW

    # Accumulator fold: accumulate k sub-slices of each x block into a
    # (rows, lane_tile/k) scratch -> accumulator vld/vst amortized ~k-fold.
    if lane_tile % 128 == 0:
        m128 = lane_tile // 128
        kf = min(8, m128)
        while m128 % kf:
            kf -= 1
        fold_w = lane_tile // kf
    else:
        fold_w, kf = lane_tile, 1

    # Row block: multiples of 8 sublanes, sized against the per-generation VMEM budget.
    per_row_p1 = 2 * lane_tile * x_item + 2 * fold_w * 4       # dbl-buffered x + f32 accumulators
    per_row_p2 = 2 * lane_tile * (x_item + x_item)             # dbl-buffered x + y
    row_cap = max(8, work_budget // max(per_row_p1, per_row_p2))
    if max_rows_per_block is not None:
        row_cap = min(row_cap, max_rows_per_block)
    # TODO(synk): if NC has no multiple-of-8 divisor <= row_cap, the full-NC fallback
    #             block may exceed the budget for extreme shapes.
    row_block = _divisor_tile(NC, 8, row_cap) or NC

    grid = (NC // row_block, HW // lane_tile)

    if training:
        # Shift by the running mean for a numerically stabler single-pass variance.
        shift_c = mean_c                                                 # (C, 1)
        shift_rows = jnp.broadcast_to(shift_c.reshape(1, C), (N, C)).reshape(NC, 1)

        sum_r, sq_r = pl.pallas_call(
            functools.partial(_partial_sums_kernel, k=kf, fold_w=fold_w),
            grid=grid,
            in_specs=[
                pl.BlockSpec((row_block, lane_tile), lambda r, t: (r, t)),
                pl.BlockSpec((row_block, 1), lambda r, t: (r, 0)),
            ],
            out_specs=(
                pl.BlockSpec((row_block, 1), lambda r, t: (r, 0)),
                pl.BlockSpec((row_block, 1), lambda r, t: (r, 0)),
            ),
            out_shape=(
                jax.ShapeDtypeStruct((NC, 1), jnp.float32),
                jax.ShapeDtypeStruct((NC, 1), jnp.float32),
            ),
            scratch_shapes=[
                pltpu.VMEM((row_block, fold_w), jnp.float32),
                pltpu.VMEM((row_block, fold_w), jnp.float32),
            ],
            compiler_params=pltpu.CompilerParams(
                dimension_semantics=("parallel", "arbitrary"),   # rows split across TCs on v7x
                vmem_limit_bytes=vmem_limit),
        )(x2, shift_rows)

        # Tiny per-channel combine + Welford merge in plain JAX (O(C) work).
        m_total = float(N * HW)
        n_batch = float(N)
        s1 = jnp.sum(sum_r.reshape(N, C), axis=0).reshape(C, 1)
        s2 = jnp.sum(sq_r.reshape(N, C), axis=0).reshape(C, 1)
        d = s1 / m_total
        batch_mean = shift_c + d
        batch_var = jnp.maximum(s2 / m_total - d * d, 0.0)

        old_count = count_s[0, 0]
        new_count = old_count + n_batch
        m_a = var_c * old_count
        m_b = batch_var * n_batch
        delta = batch_mean - mean_c
        m2 = m_a + m_b + delta * delta * (old_count * n_batch / new_count)
        upd_var = m2 / new_count
        upd_mean = (old_count * mean_c + n_batch * batch_mean) / new_count
    else:
        upd_mean, upd_var, new_count = mean_c, var_c, count_s[0, 0]

    inv_std = jax.lax.rsqrt(jnp.maximum(upd_var, 0.01))          # tiny (C, 1) op
    mean_rows = jnp.broadcast_to(upd_mean.reshape(1, C), (N, C)).reshape(NC, 1)
    inv_rows = jnp.broadcast_to(inv_std.reshape(1, C), (N, C)).reshape(NC, 1)

    y2 = pl.pallas_call(
        _normalize_kernel,
        grid=grid,
        in_specs=[
            pl.BlockSpec((row_block, lane_tile), lambda r, t: (r, t)),
            pl.BlockSpec((row_block, 1), lambda r, t: (r, 0)),
            pl.BlockSpec((row_block, 1), lambda r, t: (r, 0)),
        ],
        out_specs=pl.BlockSpec((row_block, lane_tile), lambda r, t: (r, t)),
        out_shape=jax.ShapeDtypeStruct((NC, HW), x.dtype),
        compiler_params=pltpu.CompilerParams(
            dimension_semantics=("parallel", "parallel"),
            vmem_limit_bytes=vmem_limit),
    )(x2, mean_rows, inv_rows)

    return (y2.reshape(N, C, H, W),
            upd_mean.reshape(1, C, 1, 1),
            upd_var.reshape(1, C, 1, 1),
            jnp.reshape(new_count, ()))


# --------------------------------------------------------------------------- reference

def _reference_forward(x, mean, var, count):
    """Pure-JAX reference mirroring the PyTorch module (training=True)."""
    xf = x.astype(jnp.float32)
    n = jnp.asarray(float(x.shape[0]), jnp.float32)
    batch_mean = jnp.mean(xf, axis=(0, 2, 3), keepdims=True)                  # (1,C,1,1)
    batch_var = jnp.mean((xf - batch_mean) ** 2, axis=(0, 2, 3), keepdims=True)
    new_count = count + n
    m_a = var * count
    m_b = batch_var * n
    m2 = m_a + m_b + (batch_mean - mean) ** 2 * count * n / new_count
    upd_var = m2 / new_count
    upd_mean = (count * mean + n * batch_mean) / new_count
    stdev = jnp.sqrt(jnp.maximum(upd_var, 0.01))
    return (xf - upd_mean) / stdev, upd_mean, upd_var, new_count


if __name__ == "__main__":
    N, C, H, W = 2, 4, 16, 16

    key = jax.random.PRNGKey(0)
    k1, k2, k3 = jax.random.split(key, 3)
    x1 = jax.random.normal(k1, (N, C, H, W), dtype=jnp.float32) * 2.0 + 0.5
    x2 = jax.random.normal(k2, (N, C, H, W), dtype=jnp.float32) * 1.5 - 0.3
    x3 = jax.random.normal(k3, (4, C, H, W), dtype=jnp.float32) + 1.0

    # Buffers initialized exactly as the module's __init__ does.
    mean0 = jnp.zeros((1, C, 1, 1), dtype=jnp.float32)
    var0 = jnp.zeros((1, C, 1, 1), dtype=jnp.float32)
    count0 = jnp.zeros((), dtype=jnp.float32)

    def check(got, ref, msg):
        for g, r in zip(got, ref):
            assert jnp.allclose(g, r, atol=1e-4, rtol=1e-4), msg

    # Step 1 (fresh buffers): fused fast path.
    out1 = running_mean_and_var_forward(x1, mean0, var0, count0, training=True)
    jax.block_until_ready(out1)
    ref1 = _reference_forward(x1, mean0, var0, count0)
    check(out1, ref1, "fused path mismatch (step 1)")

    # Step 2 (nonzero running stats -> exercises Welford merge + shift): fused path.
    _, m1, v1, c1 = out1
    out2 = running_mean_and_var_forward(x2, m1, v1, c1, training=True)
    jax.block_until_ready(out2)
    ref2 = _reference_forward(x2, *ref1[1:])
    check(out2, ref2, "fused path mismatch (step 2)")

    # Same step through the two-phase tiled path, multi-step lane grid (t > 1, k = 1).
    out2b = running_mean_and_var_forward(
        x2, m1, v1, c1, training=True, fused_bytes_limit=0, max_lane_tile=128)
    jax.block_until_ready(out2b)
    check(out2b, ref2, "two-phase path mismatch (step 2)")

    # Two-phase path with multiple row tiles + folded accumulator (N=4 -> NC=16, k=2).
    out3 = running_mean_and_var_forward(
        x3, m1, v1, c1, training=True,
        fused_bytes_limit=0, max_lane_tile=256, max_rows_per_block=8)
    jax.block_until_ready(out3)
    ref3 = _reference_forward(x3, m1, v1, c1)
    check(out3, ref3, "two-phase row-tiled path mismatch")

    # Eval mode: buffers unchanged, normalize with running stats.
    _, m2, v2, c2 = out2
    y_eval, m_e, v_e, c_e = running_mean_and_var_forward(x2, m2, v2, c2, training=False)
    jax.block_until_ready(y_eval)
    y_eval_ref = (x2 - m2) / jnp.sqrt(jnp.maximum(v2, 0.01))
    assert jnp.allclose(y_eval, y_eval_ref, atol=1e-4, rtol=1e-4), "eval output mismatch"
    assert jnp.allclose(c_e, c2), "eval count changed"
    assert jnp.allclose(m_e, m2) and jnp.allclose(v_e, v2), "eval stats changed"

    print("KERNEL_OK")
</pallas_src>

<mosaic_0001>
module attributes {stable_mosaic.version = 11 : i64} {
  func.func @_fused_kernel(%arg0: i32, %arg1: memref<2x4x256xf32, #tpu.memory_space<vmem>>, %arg2: memref<4x1xf32, #tpu.memory_space<vmem>>, %arg3: memref<4x1xf32, #tpu.memory_space<vmem>>, %arg4: memref<1x1xf32, #tpu.memory_space<smem>>, %arg5: memref<2x4x256xf32, #tpu.memory_space<vmem>>, %arg6: memref<4x1xf32, #tpu.memory_space<vmem>>, %arg7: memref<4x1xf32, #tpu.memory_space<vmem>>, %arg8: memref<1x1xf32, #tpu.memory_space<smem>>) attributes {dimension_semantics = [#tpu.dimension_semantics<arbitrary>], iteration_bounds = array<i64: 1>, scalar_prefetch = 0 : i64, scratch_operands = 0 : i64, tpu.core_type = #tpu.core_type<tc>, window_params = [{pipeline_mode = #tpu.pipeline_mode<synchronous>, transform_indices = @transform_0, window_bounds = array<i64: 2, 4, 256>}, {pipeline_mode = #tpu.pipeline_mode<synchronous>, transform_indices = @transform_1, window_bounds = array<i64: 4, 1>}, {pipeline_mode = #tpu.pipeline_mode<synchronous>, transform_indices = @transform_2, window_bounds = array<i64: 4, 1>}, {transform_indices = @transform_3, window_bounds = array<i64: 1, 1>}, {pipeline_mode = #tpu.pipeline_mode<synchronous>, transform_indices = @transform_4, window_bounds = array<i64: 2, 4, 256>}, {pipeline_mode = #tpu.pipeline_mode<synchronous>, transform_indices = @transform_5, window_bounds = array<i64: 4, 1>}, {pipeline_mode = #tpu.pipeline_mode<synchronous>, transform_indices = @transform_6, window_bounds = array<i64: 4, 1>}, {transform_indices = @transform_7, window_bounds = array<i64: 1, 1>}]} {
    %c0 = arith.constant 0 : index
    %c0_0 = arith.constant 0 : index
    %c0_1 = arith.constant 0 : index
    %0 = vector.load %arg1[%c0, %c0_0, %c0_1] : memref<2x4x256xf32, #tpu.memory_space<vmem>>, vector<2x4x256xf32>
    %c0_2 = arith.constant 0 : index
    %c0_3 = arith.constant 0 : index
    %1 = vector.load %arg2[%c0_2, %c0_3] : memref<4x1xf32, #tpu.memory_space<vmem>>, vector<4x1xf32>
    %2 = vector.shape_cast %1 : vector<4x1xf32> to vector<1x4x1xf32>
    %3 = vector.broadcast %2 : vector<1x4x1xf32> to vector<2x4x256xf32>
    %4 = arith.subf %0, %3 : vector<2x4x256xf32>
    %cst = arith.constant dense<0.000000e+00> : vector<2x4xf32>
    %5 = vector.multi_reduction <add>, %4, %cst [2] : vector<2x4x256xf32> to vector<2x4xf32>
    %6 = vector.shape_cast %5 : vector<2x4xf32> to vector<2x4x1xf32>
    %cst_4 = arith.constant dense<0.000000e+00> : vector<4x1xf32>
    %7 = vector.multi_reduction <add>, %6, %cst_4 [0] : vector<2x4x1xf32> to vector<4x1xf32>
    %8 = arith.mulf %4, %4 : vector<2x4x256xf32>
    %cst_5 = arith.constant dense<0.000000e+00> : vector<2x4xf32>
    %9 = vector.multi_reduction <add>, %8, %cst_5 [2] : vector<2x4x256xf32> to vector<2x4xf32>
    %10 = vector.shape_cast %9 : vector<2x4xf32> to vector<2x4x1xf32>
    %cst_6 = arith.constant dense<0.000000e+00> : vector<4x1xf32>
    %11 = vector.multi_reduction <add>, %10, %cst_6 [0] : vector<2x4x1xf32> to vector<4x1xf32>
    %cst_7 = arith.constant 5.120000e+02 : f32
    %12 = vector.broadcast %cst_7 : f32 to vector<4x1xf32>
    %13 = arith.divf %7, %12 : vector<4x1xf32>
    %14 = arith.addf %1, %13 : vector<4x1xf32>
    %cst_8 = arith.constant 5.120000e+02 : f32
    %15 = vector.broadcast %cst_8 : f32 to vector<4x1xf32>
    %16 = arith.divf %11, %15 : vector<4x1xf32>
    %17 = arith.mulf %13, %13 : vector<4x1xf32>
    %18 = arith.subf %16, %17 : vector<4x1xf32>
    %cst_9 = arith.constant 0.000000e+00 : f32
    %19 = vector.broadcast %cst_9 : f32 to vector<4x1xf32>
    %20 = arith.maximumf %18, %19 : vector<4x1xf32>
    %c0_10 = arith.constant 0 : index
    %c0_11 = arith.constant 0 : index
    %21 = vector.load %arg2[%c0_10, %c0_11] : memref<4x1xf32, #tpu.memory_space<vmem>>, vector<4x1xf32>
    %c0_12 = arith.constant 0 : index
    %c0_13 = arith.constant 0 : index
    %22 = vector.load %arg3[%c0_12, %c0_13] : memref<4x1xf32, #tpu.memory_space<vmem>>, vector<4x1xf32>
    %c0_14 = arith.constant 0 : index
    %c0_15 = arith.constant 0 : index
    %23 = memref.load %arg4[%c0_14, %c0_15] : memref<1x1xf32, #tpu.memory_space<smem>>
    %cst_16 = arith.constant 2.000000e+00 : f32
    %24 = arith.addf %23, %cst_16 : f32
    %25 = vector.broadcast %23 : f32 to vector<4x1xf32>
    %26 = arith.mulf %22, %25 : vector<4x1xf32>
    %cst_17 = arith.constant 2.000000e+00 : f32
    %27 = vector.broadcast %cst_17 : f32 to vector<4x1xf32>
    %28 = arith.mulf %20, %27 : vector<4x1xf32>
    %29 = arith.subf %14, %21 : vector<4x1xf32>
    %30 = arith.addf %26, %28 : vector<4x1xf32>
    %31 = arith.mulf %29, %29 : vector<4x1xf32>
    %cst_18 = arith.constant 2.000000e+00 : f32
    %32 = arith.mulf %23, %cst_18 : f32
    %33 = arith.divf %32, %24 : f32
    %34 = vector.broadcast %33 : f32 to vector<4x1xf32>
    %35 = arith.mulf %31, %34 : vector<4x1xf32>
    %36 = arith.addf %30, %35 : vector<4x1xf32>
    %37 = vector.broadcast %24 : f32 to vector<4x1xf32>
    %38 = arith.divf %36, %37 : vector<4x1xf32>
    %39 = vector.broadcast %23 : f32 to vector<4x1xf32>
    %40 = arith.mulf %39, %21 : vector<4x1xf32>
    %cst_19 = arith.constant 2.000000e+00 : f32
    %41 = vector.broadcast %cst_19 : f32 to vector<4x1xf32>
    %42 = arith.mulf %41, %14 : vector<4x1xf32>
    %43 = arith.addf %40, %42 : vector<4x1xf32>
    %44 = vector.broadcast %24 : f32 to vector<4x1xf32>
    %45 = arith.divf %43, %44 : vector<4x1xf32>
    %cst_20 = arith.constant 0.00999999977 : f32
    %46 = vector.broadcast %cst_20 : f32 to vector<4x1xf32>
    %47 = arith.maximumf %38, %46 : vector<4x1xf32>
    %48 = math.rsqrt %47 : vector<4x1xf32>
    %c0_21 = arith.constant 0 : index
    %c0_22 = arith.constant 0 : index
    %49 = vector.load %arg6[%c0_21, %c0_22] : memref<4x1xf32, #tpu.memory_space<vmem>>, vector<4x1xf32>
    tpu.vector_store %arg6[%c0_21, %c0_22], %45 {strides = array<i32>} : memref<4x1xf32, #tpu.memory_space<vmem>>, vector<4x1xf32>,
    %c0_23 = arith.constant 0 : index
    %c0_24 = arith.constant 0 : index
    %50 = vector.load %arg7[%c0_23, %c0_24] : memref<4x1xf32, #tpu.memory_space<vmem>>, vector<4x1xf32>
    tpu.vector_store %arg7[%c0_23, %c0_24], %38 {strides = array<i32>} : memref<4x1xf32, #tpu.memory_space<vmem>>, vector<4x1xf32>,
    %c0_25 = arith.constant 0 : index
    %c0_26 = arith.constant 0 : index
    %51 = memref.load %arg8[%c0_25, %c0_26] : memref<1x1xf32, #tpu.memory_space<smem>>
    memref.store %24, %arg8[%c0_25, %c0_26] : memref<1x1xf32, #tpu.memory_space<smem>>
    %52 = vector.shape_cast %45 : vector<4x1xf32> to vector<1x4x1xf32>
    %53 = vector.broadcast %52 : vector<1x4x1xf32> to vector<2x4x256xf32>
    %54 = arith.subf %0, %53 : vector<2x4x256xf32>
    %55 = vector.shape_cast %48 : vector<4x1xf32> to vector<1x4x1xf32>
    %56 = vector.broadcast %55 : vector<1x4x1xf32> to vector<2x4x256xf32>
    %57 = arith.mulf %54, %56 : vector<2x4x256xf32>
    %c0_27 = arith.constant 0 : index
    %c0_28 = arith.constant 0 : index
    %c0_29 = arith.constant 0 : index
    %58 = vector.load %arg5[%c0_27, %c0_28, %c0_29] : memref<2x4x256xf32, #tpu.memory_space<vmem>>, vector<2x4x256xf32>
    tpu.vector_store %arg5[%c0_27, %c0_28, %c0_29], %57 {strides = array<i32>} : memref<2x4x256xf32, #tpu.memory_space<vmem>>, vector<2x4x256xf32>,
    return
  }
  func.func @transform_0(%arg0: i32) -> (i32, i32, i32) {
    %c0_i32 = arith.constant 0 : i32
    %c0_i32_0 = arith.constant 0 : i32
    %c0_i32_1 = arith.constant 0 : i32
    %c0_i32_2 = arith.constant 0 : i32
    return %c0_i32, %c0_i32_0, %c0_i32_1 : i32, i32, i32
  }
  func.func @transform_1(%arg0: i32) -> (i32, i32) {
    %c0_i32 = arith.constant 0 : i32
    %c0_i32_0 = arith.constant 0 : i32
    %c0_i32_1 = arith.constant 0 : i32
    return %c0_i32, %c0_i32_0 : i32, i32
  }
  func.func @transform_2(%arg0: i32) -> (i32, i32) {
    %c0_i32 = arith.constant 0 : i32
    %c0_i32_0 = arith.constant 0 : i32
    %c0_i32_1 = arith.constant 0 : i32
    return %c0_i32, %c0_i32_0 : i32, i32
  }
  func.func @transform_3(%arg0: i32) -> (i32, i32) {
    %c0_i32 = arith.constant 0 : i32
    %c0_i32_0 = arith.constant 0 : i32
    %c0_i32_1 = arith.constant 0 : i32
    return %c0_i32, %c0_i32_0 : i32, i32
  }
  func.func @transform_4(%arg0: i32) -> (i32, i32, i32) {
    %c0_i32 = arith.constant 0 : i32
    %c0_i32_0 = arith.constant 0 : i32
    %c0_i32_1 = arith.constant 0 : i32
    %c0_i32_2 = arith.constant 0 : i32
    return %c0_i32, %c0_i32_0, %c0_i32_1 : i32, i32, i32
  }
  func.func @transform_5(%arg0: i32) -> (i32, i32) {
    %c0_i32 = arith.constant 0 : i32
    %c0_i32_0 = arith.constant 0 : i32
    %c0_i32_1 = arith.constant 0 : i32
    return %c0_i32, %c0_i32_0 : i32, i32
  }
  func.func @transform_6(%arg0: i32) -> (i32, i32) {
    %c0_i32 = arith.constant 0 : i32
    %c0_i32_0 = arith.constant 0 : i32
    %c0_i32_1 = arith.constant 0 : i32
    return %c0_i32, %c0_i32_0 : i32, i32
  }
  func.func @transform_7(%arg0: i32) -> (i32, i32) {
    %c0_i32 = arith.constant 0 : i32
    %c0_i32_0 = arith.constant 0 : i32
    %c0_i32_1 = arith.constant 0 : i32
    return %c0_i32, %c0_i32_0 : i32, i32
  }
}

</mosaic_0001>

<bundles_post_ra>
// kernel: tpu_custom_call.1
= control target key start
LH: loop header
LB: loop body
LE: loop exit
PB: predicated region body
PF: predicated region fallthrough
CT: control target
= control target key end

     0   :  { %14 = vsyncpa [#allocation4], 0  ;;  %s425_s0 = inlined_call_operand.hbm [shape: f32[2,4,256], index: 0, kind: input, shape index: {}]   ;;  %s426_s1 = inlined_call_operand.vmem [shape: f32[4,1], index: 1, kind: input, shape index: {}]   ;;  %s427_s2 = inlined_call_operand.vmem [shape: f32[4,1], index: 2, kind: input, shape index: {}]   ;;  %s428_s3 = inlined_call_operand.<no memory space> [shape: f32[1,1], index: 3, kind: input, shape index: {}]   ;;  %s429_s4 = inlined_call_operand.hbm [shape: f32[2,4,256], index: 4, kind: output, shape index: {0}]   ;;  %s430_s5 = inlined_call_operand.vmem [shape: f32[4,1], index: 5, kind: output, shape index: {1}]   ;;  %s431_s6 = inlined_call_operand.vmem [shape: f32[4,1], index: 6, kind: output, shape index: {2}]   ;;  %s432_s7 = inlined_call_operand.hbm [shape: f32[1,1], index: 7, kind: output, shape index: {3}]  }
   0x1   :  { %15 = vsyncpa [#allocation5], 0 }
   0x2   :  { %16 = vsyncpa [#allocation6], 0  ;;  %s277_s24 = smov [#allocation3]   ;;  %s217_s28 = scalar_lea.hbm %s425_s0, 256 }
   0x3   :  { %s22_s25 = sshll.u32 %s277_s24, 4  ;;  %p218_p0 = scmp.ne.s32.totalorder %s425_s0, %s217_s28  ;;  %s23_s25 = int_to_ptr.vmem [resolvable:$true] %s22_s25 }
   0x4   :  { %p221_p1 = scmp.lt.u32.totalorder %s217_s28, %s425_s0 }
   0x6   :  { %p223_p2 = pnand %p221_p1, %p218_p0 }
   0x8   :  { %226 = shalt.err (!%p223_p2)
}
   0x9   :  { %s227_s10 = scalar_lea.vmem %s23_s25, 256  ;;  %p232_p4 = scmp.lt.s32.totalorder %s23_s25, %s23_s25 }
   0xa   :  { %p228_p3 = scmp.ne.s32.totalorder %s23_s25, %s227_s10  ;;  %p233_p5 = scmp.lt.s32.totalorder %s227_s10, %s227_s10 }
   0xc   :  { %p234_p6 = por %p233_p5, %p232_p4 }
   0xe   :  { %p235_p7 = pnand %p234_p6, %p228_p3 }
  0x10   :  { %238 = shalt.err (!%p235_p7)
}
  0x11   :  { %s278_s11 = smov 128   ;;  %s279_s12 = smov 8  }
  0x12   :  { %28 = dma.hbm_to_vmem [thread:$0]  %s425_s0, 256, %s23_s25, [#allocation4], %s278_s11, %s278_s11, %s279_s12  }
  0x13   :  { %271 = dma.done.wait [#allocation4], 256  }
  0x14   :  { %272 = vsyncadd [#allocation4], 4294967040  ;;  %v280_v0 = vmov 0   ;;  %v342_v1 = vld [vmem:[%s426_s1] sm:$0xf]  ;;  %s105_s19 = sadd.f32 2.0, %s428_s3  ;;  %v48_v6 = vlaneseq  ;;  %v106_v39 = vstv %s428_s3 }
  0x15   :  { %211 = vset.pattern.permute.xlu0 %v280_v0  ;;  %212 = vset.pattern.permute.xlu1 %v280_v0  ;;  %v281_v4 = vmov 839922192   ;;  %v353_v11 = vld [vmem:[#allocation3] sm:$0xff]  ;;  %v355_v12 = vld [vmem:[#allocation3 + $0x8] sm:$0xff]  ;;  %vm61_vm0 = vcmask 1043456   ;;  %v123_v42 = vmul.f32 %v106_v39, %v342_v1  ;;  %s112_s22 = smul.f32 2.0, %s428_s3 }
  0x16   :  { %43 = vperm.xlu0 %211, %v342_v1   ;;  %v113_v2 = vstv %s105_s19  ;;  %133 = sst [smem:[#allocation8]] %s105_s19  ;;  %v46_v5 = vunpack.c.l.s4 %v281_v4  ;;  %v49_v8 = vshrl.u32 %v48_v6, 7  ;;  %vm129_vm1 = vcmask 3072   ;;  %v103_v54 = vld [vmem:[%s427_s2] sm:$0xf]  ;;  %s239_s30 = scalar_lea.hbm %s432_s7, 16 }
  0x17   :  { %213 = vrcp.f32 %v113_v2  ;;  %v107_v57 = vmul.f32 %v106_v39, %v103_v54  ;;  %p240_p8 = scmp.ne.s32.totalorder %s432_s7, %s239_s30  ;;  %p243_p9 = scmp.lt.u32.totalorder %s239_s30, %s432_s7 }
  0x18   :  { %v47_v7 = vunpack.c.0.s8 %v46_v5 }
  0x19   :  { %p245_p10 = pnand %p243_p9, %p240_p8 }
  0x1a   :  { %v351_v9 = vsub.s32 %v47_v7, %v49_v8 }
  0x21   :  { %v348_v3 = vpop.eup %213 }
  0x22   :  { %202 = vpush %v348_v3 }
  0x53   :  { %s203_s23 = spop %202 }
  0x54   :  { %s116_s24 = smul.f32 %s203_s23, %s112_s22 }
  0x56   :  { %v117_v59 = vstv %s116_s24 }
  0x95   :  { %v44_v10 = vpop.permute.xlu0 %43 }
  0x96   :  { %v51_v13 = vrot.slane %v44_v10, %v351_v9 }
  0x98   :  { %v53_v14 = vsub.f32 %v353_v11, %v51_v13  ;;  %v54_v15 = vsub.f32 %v355_v12, %v51_v13 }
  0x9a   :  { %v58_v16 = vcombine.high %v54_v15, %v54_v15  ;;  %v57_v17 = vcombine.high %v53_v14, %v53_v14  ;;  %v75_v18 = vmul.f32 %v53_v14, %v53_v14  ;;  %v76_v19 = vmul.f32 %v54_v15, %v54_v15 }
  0x9b   :  { %v67_v20 = vsel %vm61_vm0, %v54_v15, 0.0  ;;  %v62_v22 = vsel %vm61_vm0, %v53_v14, 0.0 }
  0x9c   :  { %v68_v21 = vsel %vm61_vm0, %v58_v16, 0.0  ;;  %v63_v23 = vsel %vm61_vm0, %v57_v17, 0.0  ;;  %v79_v26 = vcombine.high %v75_v18, %v75_v18  ;;  %v80_v27 = vcombine.high %v76_v19, %v76_v19 }
  0x9d   :  { %v69_v24 = vadd.f32 %v68_v21, %v67_v20  ;;  %v64_v25 = vadd.f32 %v63_v23, %v62_v22  ;;  %v83_v29 = vsel %vm61_vm0, %v75_v18, 0.0  ;;  %v88_v32 = vsel %vm61_vm0, %v76_v19, 0.0 }
  0x9e   :  { %v84_v28 = vsel %vm61_vm0, %v79_v26, 0.0  ;;  %v89_v31 = vsel %vm61_vm0, %v80_v27, 0.0 }
  0x9f   :  { %70 = vadd.xlane.f32.xlu1 %v69_v24  ;;  %65 = vadd.xlane.f32.xlu0 %v64_v25  ;;  %v85_v30 = vadd.f32 %v84_v28, %v83_v29  ;;  %v90_v33 = vadd.f32 %v89_v31, %v88_v32 }
  0xa3   :  { %86 = vadd.xlane.f32.xlu1 %v85_v30 }
  0xa7   :  { %91 = vadd.xlane.f32.xlu1 %v90_v33 }
 0x12c   :  { %v71_v34 = vpop.xlane.xlu1 %70  ;;  %v66_v35 = vpop.xlane.xlu0 %65 }
 0x12d   :  { %v73_v36 = vsel %vm61_vm0, %v71_v34, 0.0  ;;  %v72_v37 = vsel %vm61_vm0, %v66_v35, 0.0 }
 0x12e   :  { %v74_v38 = vadd.f32 %v73_v36, %v72_v37 }
 0x130   :  { %v97_v40 = vmul.f32 0.001953125, %v74_v38  ;;  %v87_v41 = vpop.xlane.xlu1 %86 }
 0x131   :  { %v93_v46 = vsel %vm61_vm0, %v87_v41, 0.0 }
 0x132   :  { %v98_v43 = vadd.f32 %v97_v40, %v342_v1  ;;  %v100_v50 = vmul.f32 %v97_v40, %v97_v40 }
 0x134   :  { %v124_v44 = vmul.f32 2.0, %v98_v43  ;;  %v92_v45 = vpop.xlane.xlu1 %91  ;;  %v109_v51 = vsub.f32 %v98_v43, %v342_v1 }
 0x135   :  { %v94_v47 = vsel %vm61_vm0, %v92_v45, 0.0 }
 0x136   :  { %v95_v48 = vadd.f32 %v94_v47, %v93_v46  ;;  %v125_v49 = vadd.f32 %v124_v44, %v123_v42  ;;  %v111_v56 = vmul.f32 %v109_v51, %v109_v51 }
 0x138   :  { %v99_v52 = vmul.f32 0.001953125, %v95_v48  ;;  %v126_v53 = vmul.f32 %v348_v3, %v125_v49  ;;  %v118_v61 = vmul.f32 %v117_v59, %v111_v56 }
 0x13a   :  { %v101_v55 = vsub.f32 %v99_v52, %v100_v50  ;;  %136 = vperm.xlu1 %212, %v126_v53   ;;  %130 = vst.msk [vmem:[%s430_s5] sm:$0xf] %vm129_vm1, %v126_v53 }
 0x13c   :  { %v102_v58 = vmax.f32 %v101_v55, 0.0 }
 0x13e   :  { %v108_v60 = vmul.f32 2.0, %v102_v58 }
 0x140   :  { %v110_v62 = vadd.f32 %v108_v60, %v107_v57 }
 0x142   :  { %v119_v63 = vadd.f32 %v118_v61, %v110_v62 }
 0x144   :  { %v122_v0 = vmul.f32 %v348_v3, %v119_v63 }
 0x146   :  { %v127_v1 = vmax.f32 %v122_v0, 0.01  ;;  %131 = vst.msk [vmem:[%s431_s6] sm:$0xf] %vm129_vm1, %v122_v0 }
 0x148   :  { %215 = vrsqrt.f32 %v127_v1 }
 0x152   :  { %v216_v2 = vpop.eup %215 }
 0x153   :  { %150 = vperm.xlu1 %212, %v216_v2  }
 0x154   :  { %248 = shalt.err (!%p245_p10)
}
 0x155   :  { %s282_s14 = smov [#allocation8]   ;;  %s283_s16 = smov [#allocation7]  }
 0x156   :  { %187 = dma.smem_to_hbm %s282_s14, 16, %s432_s7, [#allocation6]  }
 0x157   :  { %s169_s17 = sshll.u32 %s283_s16, 4  ;;  %s170_s17 = int_to_ptr.vmem [resolvable:$true] %s169_s17 }
 0x158   :  { %s249_s18 = scalar_lea.vmem %s170_s17, 256  ;;  %p254_p12 = scmp.lt.s32.totalorder %s170_s17, %s170_s17 }
 0x159   :  { %p250_p11 = scmp.ne.s32.totalorder %s170_s17, %s249_s18  ;;  %p255_p13 = scmp.lt.s32.totalorder %s249_s18, %s249_s18 }
 0x15b   :  { %p256_p0 = por %p255_p13, %p254_p12 }
 0x15d   :  { %p257_p1 = pnand %p256_p0, %p250_p11 }
 0x1b9   :  { %v137_v3 = vpop.permute.xlu1 %136 }
 0x1ba   :  { %v144_v4 = vrot.slane %v137_v3, %v351_v9 }
 0x1bc   :  { %v146_v6 = vsub.f32 %v353_v11, %v144_v4  ;;  %v147_v7 = vsub.f32 %v355_v12, %v144_v4 }
 0x1d2   :  { %v151_v5 = vpop.permute.xlu1 %150 }
 0x1d3   :  { %v158_v8 = vrot.slane %v151_v5, %v351_v9 }
 0x1d5   :  { %v160_v10 = vmul.f32 %v158_v8, %v146_v6  ;;  %v161_v13 = vmul.f32 %v158_v8, %v147_v7 }
 0x1d7   :  { %162 = vst [vmem:[#allocation7] sm:$0xff] %v160_v10  ;;  %163 = vst [vmem:[#allocation7 + $0x8] sm:$0xff] %v161_v13 }
 0x1d8   :  { %260 = shalt.err (!%p257_p1)
}
 0x1d9   :  { %s261_s0 = scalar_lea.hbm %s429_s4, 256 }
 0x1da   :  { %p262_p2 = scmp.ne.s32.totalorder %s429_s4, %s261_s0  ;;  %p265_p3 = scmp.lt.u32.totalorder %s261_s0, %s429_s4 }
 0x1dc   :  { %p267_p4 = pnand %p265_p3, %p262_p2 }
 0x1de   :  { %270 = shalt.err (!%p267_p4)
}
 0x1df   :  { %175 = dma.vmem_to_hbm [thread:$0]  %s170_s17, 256, %s429_s4, [#allocation5], %s278_s11, %s278_s11, %s279_s12  }
 0x1e0   :  { %273 = dma.done.wait [#allocation5], 256  }
 0x1e1   :  { %274 = vsyncadd [#allocation5], 4294967040 }
 0x1e2   :  { %275 = dma.done.wait [#allocation6], 16  }
 0x1e3   :  { %276 = vsyncadd [#allocation6], 4294967280 }
 0x1e4   :  { %198 = sfence }
 0x1e5   :  { %199 = vsyncpa [#allocation4], 1 }
 0x1e6   :  { %200 = vsyncpa [#allocation5], 1 }
 0x1e7   :  { %201 = vsyncpa [#allocation6], 1 }

</bundles_post_ra>
